<compile_context>
chip_gen: v7x
topology: tpu7x:2x2x1
jax: 0.10.0
libtpu: 0.0.40
codegen_flags: <defaults>
</compile_context>

<pallas_src>
import functools

import jax
import jax.numpy as jnp
from jax.experimental import pallas as pl
from jax.experimental.pallas import tpu as pltpu

_LANE = 128     # vreg lane width
_SUBLANE = 8    # vreg sublane count (f32)


def _round_up(n, m):
    return ((n + m - 1) // m) * m


def _gaussian_mlp_kernel(x_ref, w1_ref, b1_ref, w2_ref, b2_ref, out_ref, *, d_out):
    # x   : [TM, d_in]        (unpadded K; Mosaic pads the contraction internally)
    # w1  : [d_in, d_hid_p]   b1: [1, d_hid_p]
    # w2  : [d_hid_p, d2_p]   packed [mu cols | var cols | zero pad], b2: [1, d2_p]
    # out : [TM, d2_p]        packed: lanes [0,d_out)=mu, [d_out,2*d_out)=var
    h = jnp.dot(x_ref[...], w1_ref[...], preferred_element_type=jnp.float32)
    h = jnp.maximum(h + b1_ref[...], 0.0)                      # ReLU

    # Single fused head matmul (N = d2_p) on the MXU.
    z = jnp.dot(h, w2_ref[...], preferred_element_type=jnp.float32) + b2_ref[...]

    # Numerically-stable softplus(z) + 1e-6 on var lanes; identity on mu lanes.
    sp = jnp.maximum(z, 0.0) + jnp.log1p(jnp.exp(-jnp.abs(z))) + 1e-6
    lane = jax.lax.broadcasted_iota(jnp.int32, z.shape, dimension=1)
    out_ref[...] = jnp.where(lane < d_out, z, sp)


def pad_gaussian_mlp_params(w1, b1, w2, b2, d_out):
    """One-time (init-time) lane padding / packing of the weights.

    w1: [d_in, d_hidden]   b1: [d_hidden]
    w2: [d_hidden, 2*d_out] (mu columns first, var columns second — kept as-is)
    b2: [2*d_out]
    """
    f32 = jnp.float32
    d_in, d_hidden = w1.shape
    d_hid_p = _round_up(d_hidden, _LANE)
    d2 = 2 * d_out
    d2_p = _round_up(d2, _LANE)

    w1_p = jnp.zeros((d_in, d_hid_p), f32).at[:, :d_hidden].set(w1.astype(f32))
    b1_p = jnp.zeros((1, d_hid_p), f32).at[0, :d_hidden].set(b1.astype(f32).reshape(-1))
    w2_p = jnp.zeros((d_hid_p, d2_p), f32).at[:d_hidden, :d2].set(w2.astype(f32))
    b2_p = jnp.zeros((1, d2_p), f32).at[0, :d2].set(b2.astype(f32).reshape(-1))
    return w1_p, b1_p, w2_p, b2_p


@functools.partial(jax.jit, static_argnames=("d_out", "block_b"))
def gaussian_mlp_forward(x, w1_p, b1_p, w2_p, b2_p, *, d_out, block_b=4096):
    """Returns (mu [B, d_out], var [B, d_out])."""
    B, d_in = x.shape
    d_hid_p = w1_p.shape[1]
    d2_p = w2_p.shape[1]
    f32 = jnp.float32

    # Batch tile: big tiles to amortize per-grid-step overhead, but never larger
    # than the (sublane-rounded) batch. Grid is ragged; Pallas masks the last block.
    tm = min(block_b, _round_up(B, _SUBLANE))
    grid = (pl.cdiv(B, tm),)

    kernel = functools.partial(_gaussian_mlp_kernel, d_out=d_out)

    out = pl.pallas_call(
        kernel,
        grid=grid,
        in_specs=[
            pl.BlockSpec((tm, d_in), lambda i: (i, 0)),       # x, tiled on batch
            pl.BlockSpec((d_in, d_hid_p), lambda i: (0, 0)),  # w1 (resident)
            pl.BlockSpec((1, d_hid_p), lambda i: (0, 0)),     # b1 (resident)
            pl.BlockSpec((d_hid_p, d2_p), lambda i: (0, 0)),  # w2 packed (resident)
            pl.BlockSpec((1, d2_p), lambda i: (0, 0)),        # b2 (resident)
        ],
        out_specs=pl.BlockSpec((tm, d2_p), lambda i: (i, 0)),
        out_shape=jax.ShapeDtypeStruct((B, d2_p), f32),       # packed mu|var
        compiler_params=pltpu.CompilerParams(
            dimension_semantics=("parallel",),   # shard batch grid across v7x's 2 TCs
            vmem_limit_bytes=32 * 1024 * 1024,   # safe per-TC budget on v5e/v6e/v7x
        ),
    )(x.astype(f32), w1_p, b1_p, w2_p, b2_p)

    mu = out[:, :d_out]
    var = out[:, d_out:2 * d_out]
    return mu, var


# TODO(synk): the module's loss() (Gaussian NLL reduction) is a separate method,
# not part of forward(); it is left to plain JAX.

if __name__ == "__main__":
    # Small shapes consistent with the module: B=8, d_in=4, d_hidden=32, d_out=2
    B, d_in, d_hidden, d_out = 8, 4, 32, 2

    key = jax.random.PRNGKey(0)
    kx, k1, k2, k3, k4 = jax.random.split(key, 5)

    x = jax.random.normal(kx, (B, d_in), dtype=jnp.float32)

    # Deterministic parameter init (uniform, nn.Linear-style scale).
    bound1 = 1.0 / (d_in ** 0.5)
    w1 = jax.random.uniform(k1, (d_in, d_hidden), jnp.float32, -bound1, bound1)
    b1 = jax.random.uniform(k2, (d_hidden,), jnp.float32, -bound1, bound1)
    bound2 = 1.0 / (d_hidden ** 0.5)
    w2 = jax.random.uniform(k3, (d_hidden, 2 * d_out), jnp.float32, -bound2, bound2)
    b2 = jax.random.uniform(k4, (2 * d_out,), jnp.float32, -bound2, bound2)

    # One-time weight padding/packing (hoisted out of the per-call path).
    params = pad_gaussian_mlp_params(w1, b1, w2, b2, d_out)

    mu, var = gaussian_mlp_forward(x, *params, d_out=d_out)
    jax.block_until_ready((mu, var))

    # Pure-JAX reference (literal translation of the PyTorch forward).
    h_ref = jnp.maximum(x @ w1 + b1, 0.0)
    out_ref = h_ref @ w2 + b2
    mu_ref = out_ref[:, :d_out]
    var_ref = jnp.log(1.0 + jnp.exp(out_ref[:, d_out:])) + 1e-6

    assert mu.shape == (B, d_out) and var.shape == (B, d_out)
    assert jnp.allclose(mu, mu_ref, atol=1e-5, rtol=1e-5)
    assert jnp.allclose(var, var_ref, atol=1e-5, rtol=1e-5)
    assert bool(jnp.all(var > 0))

    print("KERNEL_OK")
</pallas_src>

<mosaic_0001>
module attributes {stable_mosaic.version = 11 : i64} {
  func.func @_gaussian_mlp_kernel(%arg0: i32, %arg1: memref<8x4xf32, #tpu.memory_space<vmem>>, %arg2: memref<4x128xf32, #tpu.memory_space<vmem>>, %arg3: memref<1x128xf32, #tpu.memory_space<vmem>>, %arg4: memref<128x128xf32, #tpu.memory_space<vmem>>, %arg5: memref<1x128xf32, #tpu.memory_space<vmem>>, %arg6: memref<8x128xf32, #tpu.memory_space<vmem>>) attributes {dimension_semantics = [#tpu.dimension_semantics<parallel>], iteration_bounds = array<i64: 1>, scalar_prefetch = 0 : i64, scratch_operands = 0 : i64, tpu.core_type = #tpu.core_type<tc>, window_params = [{transform_indices = @transform_0, window_bounds = array<i64: 8, 4>}, {pipeline_mode = #tpu.pipeline_mode<synchronous>, transform_indices = @transform_1, window_bounds = array<i64: 4, 128>}, {pipeline_mode = #tpu.pipeline_mode<synchronous>, transform_indices = @transform_2, window_bounds = array<i64: 1, 128>}, {pipeline_mode = #tpu.pipeline_mode<synchronous>, transform_indices = @transform_3, window_bounds = array<i64: 128, 128>}, {pipeline_mode = #tpu.pipeline_mode<synchronous>, transform_indices = @transform_4, window_bounds = array<i64: 1, 128>}, {transform_indices = @transform_5, window_bounds = array<i64: 8, 128>}]} {
    %c0 = arith.constant 0 : index
    %c0_0 = arith.constant 0 : index
    %0 = vector.load %arg1[%c0, %c0_0] : memref<8x4xf32, #tpu.memory_space<vmem>>, vector<8x4xf32>
    %c0_1 = arith.constant 0 : index
    %c0_2 = arith.constant 0 : index
    %1 = vector.load %arg2[%c0_1, %c0_2] : memref<4x128xf32, #tpu.memory_space<vmem>>, vector<4x128xf32>
    %cst = arith.constant dense<0.000000e+00> : vector<8x128xf32>
    %2 = tpu.matmul %0, %1, %cst {dimension_numbers = #tpu.dot_dimension_numbers<[1], [0], [0], [1], [0, 0, 1, 1], [], []>} : vector<8x4xf32>, vector<4x128xf32>, vector<8x128xf32> -> vector<8x128xf32>
    %c0_3 = arith.constant 0 : index
    %c0_4 = arith.constant 0 : index
    %3 = vector.load %arg3[%c0_3, %c0_4] : memref<1x128xf32, #tpu.memory_space<vmem>>, vector<1x128xf32>
    %4 = vector.broadcast %3 : vector<1x128xf32> to vector<8x128xf32>
    %5 = arith.addf %2, %4 : vector<8x128xf32>
    %cst_5 = arith.constant 0.000000e+00 : f32
    %6 = vector.broadcast %cst_5 : f32 to vector<8x128xf32>
    %7 = arith.maximumf %5, %6 : vector<8x128xf32>
    %c0_6 = arith.constant 0 : index
    %c0_7 = arith.constant 0 : index
    %8 = vector.load %arg4[%c0_6, %c0_7] : memref<128x128xf32, #tpu.memory_space<vmem>>, vector<128x128xf32>
    %cst_8 = arith.constant dense<0.000000e+00> : vector<8x128xf32>
    %9 = tpu.matmul %7, %8, %cst_8 {dimension_numbers = #tpu.dot_dimension_numbers<[1], [0], [0], [1], [0, 0, 1, 1], [], []>} : vector<8x128xf32>, vector<128x128xf32>, vector<8x128xf32> -> vector<8x128xf32>
    %c0_9 = arith.constant 0 : index
    %c0_10 = arith.constant 0 : index
    %10 = vector.load %arg5[%c0_9, %c0_10] : memref<1x128xf32, #tpu.memory_space<vmem>>, vector<1x128xf32>
    %11 = vector.broadcast %10 : vector<1x128xf32> to vector<8x128xf32>
    %12 = arith.addf %9, %11 : vector<8x128xf32>
    %cst_11 = arith.constant 0.000000e+00 : f32
    %13 = vector.broadcast %cst_11 : f32 to vector<8x128xf32>
    %14 = arith.maximumf %12, %13 : vector<8x128xf32>
    %15 = math.absf %12 : vector<8x128xf32>
    %cst_12 = arith.constant 0.000000e+00 : f32
    %16 = vector.broadcast %cst_12 : f32 to vector<8x128xf32>
    %17 = arith.subf %16, %15 : vector<8x128xf32>
    %18 = math.exp %17 : vector<8x128xf32>
    %19 = math.log1p %18 : vector<8x128xf32>
    %20 = arith.addf %14, %19 : vector<8x128xf32>
    %cst_13 = arith.constant 9.99999997E-7 : f32
    %21 = vector.broadcast %cst_13 : f32 to vector<8x128xf32>
    %22 = arith.addf %20, %21 : vector<8x128xf32>
    %23 = tpu.iota {dimensions = array<i32: 1>} : vector<8x128xi32>
    %c2_i32 = arith.constant 2 : i32
    %24 = vector.broadcast %c2_i32 : i32 to vector<8x128xi32>
    %25 = arith.cmpi slt, %23, %24 : vector<8x128xi32>
    %26 = arith.select %25, %12, %22 : vector<8x128xi1>, vector<8x128xf32>
    %c0_14 = arith.constant 0 : index
    %c0_15 = arith.constant 0 : index
    %27 = vector.load %arg6[%c0_14, %c0_15] : memref<8x128xf32, #tpu.memory_space<vmem>>, vector<8x128xf32>
    tpu.vector_store %arg6[%c0_14, %c0_15], %26 {strides = array<i32>} : memref<8x128xf32, #tpu.memory_space<vmem>>, vector<8x128xf32>,
    return
  }
  func.func @transform_0(%arg0: i32) -> (i32, i32) {
    %c0_i32 = arith.constant 0 : i32
    %c0_i32_0 = arith.constant 0 : i32
    return %arg0, %c0_i32 : i32, i32
  }
  func.func @transform_1(%arg0: i32) -> (i32, i32) {
    %c0_i32 = arith.constant 0 : i32
    %c0_i32_0 = arith.constant 0 : i32
    %c0_i32_1 = arith.constant 0 : i32
    return %c0_i32, %c0_i32_0 : i32, i32
  }
  func.func @transform_2(%arg0: i32) -> (i32, i32) {
    %c0_i32 = arith.constant 0 : i32
    %c0_i32_0 = arith.constant 0 : i32
    %c0_i32_1 = arith.constant 0 : i32
    return %c0_i32, %c0_i32_0 : i32, i32
  }
  func.func @transform_3(%arg0: i32) -> (i32, i32) {
    %c0_i32 = arith.constant 0 : i32
    %c0_i32_0 = arith.constant 0 : i32
    %c0_i32_1 = arith.constant 0 : i32
    return %c0_i32, %c0_i32_0 : i32, i32
  }
  func.func @transform_4(%arg0: i32) -> (i32, i32) {
    %c0_i32 = arith.constant 0 : i32
    %c0_i32_0 = arith.constant 0 : i32
    %c0_i32_1 = arith.constant 0 : i32
    return %c0_i32, %c0_i32_0 : i32, i32
  }
  func.func @transform_5(%arg0: i32) -> (i32, i32) {
    %c0_i32 = arith.constant 0 : i32
    %c0_i32_0 = arith.constant 0 : i32
    return %arg0, %c0_i32 : i32, i32
  }
}

</mosaic_0001>

<bundles_post_ra>
// kernel: gaussian_mlp_forward.1
= control target key start
LH: loop header
LB: loop body
LE: loop exit
PB: predicated region body
PF: predicated region fallthrough
CT: control target
= control target key end

     0   :  { %10 = vsyncpa [#allocation3], 0  ;;  %s362_s18 = smov [#allocation2]   ;;  %s425_s0 = inlined_call_operand.vmem [shape: f32[8,4], index: 0, kind: input, shape index: {}]   ;;  %s426_s1 = inlined_call_operand.vmem [shape: f32[4,128], index: 1, kind: input, shape index: {}]   ;;  %s427_s2 = inlined_call_operand.vmem [shape: f32[1,128], index: 2, kind: input, shape index: {}]   ;;  %s428_s3 = inlined_call_operand.hbm [shape: f32[128,128], index: 3, kind: input, shape index: {}]   ;;  %s429_s4 = inlined_call_operand.vmem [shape: f32[1,128], index: 4, kind: input, shape index: {}]   ;;  %s430_s5 = inlined_call_operand.vmem [shape: f32[8,128], index: 5, kind: output, shape index: {}]  }
   0x1   :  { %s22_s19 = sshll.u32 %s362_s18, 4  ;;  %s338_s22 = scalar_lea.hbm %s428_s3, 2048  ;;  %s23_s19 = int_to_ptr.vmem [resolvable:$true] %s22_s19 }
   0x2   :  { %p339_p0 = scmp.ne.s32.totalorder %s428_s3, %s338_s22  ;;  %p342_p1 = scmp.lt.u32.totalorder %s338_s22, %s428_s3 }
   0x4   :  { %p344_p2 = pnand %p342_p1, %p339_p0 }
   0x6   :  { %347 = shalt.err (!%p344_p2)
}
   0x7   :  { %s348_s27 = scalar_lea.vmem %s23_s19, 2048  ;;  %p353_p4 = scmp.lt.s32.totalorder %s23_s19, %s23_s19 }
   0x8   :  { %p349_p3 = scmp.ne.s32.totalorder %s23_s19, %s348_s27  ;;  %p354_p5 = scmp.lt.s32.totalorder %s348_s27, %s348_s27 }
   0xa   :  { %p355_p6 = por %p354_p5, %p353_p4 }
   0xc   :  { %p356_p7 = pnand %p355_p6, %p349_p3 }
   0xe   :  { %359 = shalt.err (!%p356_p7)
}
   0xf   :  { %s363_s28 = smov 128   ;;  %s364_s29 = smov 8  }
  0x10   :  { %28 = dma.hbm_to_vmem [thread:$0]  %s428_s3, 2048, %s23_s19, [#allocation3], %s363_s28, %s363_s28, %s364_s29  }
  0x11   :  { %360 = dma.done.wait [#allocation3], 2048  }
  0x12   :  { %361 = vsyncadd [#allocation3], 4294965248  ;;  %v365_v0 = vmov 0.0   ;;  %vm366_vm0 = vmmov 0   ;;  %v367_v1 = vmov 0.0|0.0   ;;  %vm47_vm1 = vcmask 1043456  }
  0x13   :  { %264 = vmatprep.subr.mxu0 %v365_v0  ;;  %266 = vmatprep.mubr.msk.f32.mxu0 %vm366_vm0, %v365_v0  ;;  %vm43_vm2 = vcmask 31744   ;;  %v35_v2 = vld [vmem:[%s426_s1] sm:$0xf]  ;;  %v123_v5 = vld [vmem:[#allocation2 + $0x8] sm:$0xff]  ;;  %v124_v6 = vld [vmem:[#allocation2 + $0x10] sm:$0xff]  ;;  %v231_v44 = vlaneseq }
  0x14   :  { %304 = vmatprep.subr.bf16.mxu1 %v367_v1  ;;  %301 = vmatprep.mubr.msk.f32.mxu1 %vm366_vm0, %v365_v0  ;;  %v34_v3 = vld [vmem:[%s425_s0] sm:$0xff]  ;;  %v125_v7 = vld [vmem:[#allocation2 + $0x18] sm:$0xff]  ;;  %v127_v11 = vld [vmem:[#allocation2 + $0x28] sm:$0xff] }
  0x15   :  { %v122_v4 = vld [vmem:[#allocation2] sm:$0xff]  ;;  %265 = vmatpush3.msk.msra.mxu0 %vm47_vm1, %v35_v2  ;;  %v308_v9 = vpack.c.bf16 %v125_v7, %v124_v6  ;;  %v128_v13 = vld [vmem:[#allocation2 + $0x30] sm:$0xff]  ;;  %v129_v14 = vld [vmem:[#allocation2 + $0x38] sm:$0xff]  ;;  %v232_v49 = vand.u32 127, %v231_v44 }
  0x16   :  { %267 = vmatmul.mubr.msk.f32.vlgmr.msra.gmra.mrb[0].mxu0 %vm43_vm2, %v34_v3  ;;  %v305_v8 = vpack.c.bf16 %v123_v5, %v122_v4  ;;  %v126_v10 = vld [vmem:[#allocation2 + $0x20] sm:$0xff]  ;;  %v314_v15 = vpack.c.bf16 %v129_v14, %v128_v13  ;;  %v131_v17 = vld [vmem:[#allocation2 + $0x48] sm:$0xff]  ;;  %v132_v19 = vld [vmem:[#allocation2 + $0x50] sm:$0xff] }
  0x17   :  { %v311_v12 = vpack.c.bf16 %v127_v11, %v126_v10  ;;  %v130_v16 = vld [vmem:[#allocation2 + $0x40] sm:$0xff]  ;;  %v133_v20 = vld [vmem:[#allocation2 + $0x58] sm:$0xff]  ;;  %v135_v23 = vld [vmem:[#allocation2 + $0x68] sm:$0xff]  ;;  %vm233_vm4 = vcmp.lt.s32.totalorder %v232_v49, 2 }
  0x18   :  { %306 = vmatpush3.bf16.msra.mxu1 %v305_v8  ;;  %v317_v18 = vpack.c.bf16 %v131_v17, %v130_v16  ;;  %v320_v21 = vpack.c.bf16 %v133_v20, %v132_v19  ;;  %v134_v22 = vld [vmem:[#allocation2 + $0x60] sm:$0xff]  ;;  %v136_v25 = vld [vmem:[#allocation2 + $0x70] sm:$0xff]  ;;  %v137_v26 = vld [vmem:[#allocation2 + $0x78] sm:$0xff] }
  0x19   :  { %307 = vmatprep.subr.bf16.mxu1 %v367_v1  ;;  %v323_v24 = vpack.c.bf16 %v135_v23, %v134_v22  ;;  %v326_v27 = vpack.c.bf16 %v137_v26, %v136_v25  ;;  %v241_v28 = vld [vmem:[%s427_s2] ss:$0 sm:$0xff] }
  0x1a   :  { %v244_v33 = vld [vmem:[%s429_s4] ss:$0 sm:$0xff] }
  0x1c   :  { %309 = vmatpush3.bf16.msra.mxu1 %v308_v9 }
  0x1d   :  { %310 = vmatprep.subr.bf16.mxu1 %v367_v1 }
  0x20   :  { %312 = vmatpush3.bf16.msra.mxu1 %v311_v12 }
  0x21   :  { %313 = vmatprep.subr.bf16.mxu1 %v367_v1 }
  0x24   :  { %315 = vmatpush3.bf16.msra.mxu1 %v314_v15 }
  0x25   :  { %316 = vmatprep.subr.bf16.mxu1 %v367_v1 }
  0x28   :  { %318 = vmatpush3.bf16.msra.mxu1 %v317_v18 }
  0x29   :  { %319 = vmatprep.subr.bf16.mxu1 %v367_v1 }
  0x2c   :  { %321 = vmatpush3.bf16.msra.mxu1 %v320_v21 }
  0x2d   :  { %322 = vmatprep.subr.bf16.mxu1 %v367_v1 }
  0x30   :  { %324 = vmatpush3.bf16.msra.mxu1 %v323_v24 }
  0x31   :  { %325 = vmatprep.subr.bf16.mxu1 %v367_v1 }
  0x34   :  { %327 = vmatpush3.bf16.msra.mxu1 %v326_v27 }
  0xe9   :  { %v117_v29 = vpop.f32.mrb[0].mxu0 }
  0xea   :  { %v118_v30 = vadd.f32 %v241_v28, %v117_v29  ;;  %v268_v31 = vpop.f32.mrb[1].mxu0 }
  0xec   :  { %v121_v32 = vmax.f32 %v118_v30, 0.0 }
  0xee   :  { %302 = vmatmul.mubr.f32.vlgmr.msra.gmra.mrb[0].mxu1 %v121_v32 }
 0x1c1   :  { %v211_v34 = vpop.f32.mrb[0].mxu1 }
 0x1c2   :  { %v212_v35 = vadd.f32 %v244_v33, %v211_v34  ;;  %v303_v36 = vpop.f32.mrb[1].mxu1 }
 0x1c4   :  { %v216_v37 = vand.u32 2147483647, %v212_v35  ;;  %v215_v50 = vmax.f32 %v212_v35, 0.0 }
 0x1c6   :  { %v217_v38 = vsub.f32 0.0, %v216_v37 }
 0x1c8   :  { %v218_v39 = vmul.f32 1.442695, %v217_v38 }
 0x1ca   :  { %334 = vpow2.f32 %v218_v39 }
 0x1d4   :  { %v335_v40 = vpop.eup %334 }
 0x1d5   :  { %v220_v41 = vadd.f32 1.0, %v335_v40  ;;  %v223_v42 = vmul.f32 -0.5, %v335_v40  ;;  %v226_v45 = vand.u32 2147483647, %v335_v40 }
 0x1d7   :  { %336 = vlog2.f32 %v220_v41  ;;  %v224_v43 = vadd.f32 1.0, %v223_v42  ;;  %vm227_vm3 = vcmp.lt.f32.partialorder %v226_v45, 0.0004427343 }
 0x1d9   :  { %v225_v48 = vmul.f32 %v335_v40, %v224_v43 }
 0x1e1   :  { %v337_v46 = vpop.eup %336 }
 0x1e2   :  { %v222_v47 = vmul.f32 0.6931472, %v337_v46 }
 0x1e4   :  { %v228_v51 = vsel %vm227_vm3, %v225_v48, %v222_v47 }
 0x1e5   :  { %v229_v52 = vadd.f32 %v228_v51, %v215_v50 }
 0x1e7   :  { %v230_v53 = vadd.f32 1e-06, %v229_v52 }
 0x1e9   :  { %v234_v54 = vsel %vm233_vm4, %v212_v35, %v230_v53 }
 0x1ea   :  { %235 = vst [vmem:[%s430_s5] sm:$0xff] %v234_v54 }
 0x1eb   :  { %240 = vsyncpa [#allocation3], 1 }

</bundles_post_ra>
